<compile_context>
chip_gen: v5e
topology: v5e:2x2
jax: 0.10.0
libtpu: 0.0.40
codegen_flags: <defaults>
</compile_context>

<pallas_src>
import functools

import jax
import jax.numpy as jnp
from jax import lax
from jax.experimental import pallas as pl
from jax.experimental.pallas import tpu as pltpu

_LANES = 128      # vreg lane width
_SUBLANES = 8     # vreg sublane count (f32)


def _round_up(x: int, m: int) -> int:
    return (x + m - 1) // m * m


def _mlp_kernel(x_ref, w1_ref, b1_ref, w23t_ref, b23t_ref, ot_ref):
    """One batch tile of the fused (folded) MLP, transposed output.

    x_ref:     (tb, in)        f32 (cast to bf16 in-kernel)
    w1_ref:    (in, h1)        bf16
    b1_ref:    (1, h1)         f32
    w23t_ref:  (out8, h1)      bf16   ((W2 @ W3)^T, rows padded to 8)
    b23t_ref:  (out8, 1)       f32    ((b2 @ W3 + b3)^T, rows padded to 8)
    ot_ref:    (out8, tb)      f32    y^T — batch on the lane axis
    """
    # In-kernel bf16 cast of the activation stream (free VPU work).
    x = x_ref[...].astype(w1_ref.dtype)

    # Layer 1: Linear + ReLU (f32 accumulate, f32 epilogue).
    h1 = jnp.dot(x, w1_ref[...], preferred_element_type=jnp.float32) + b1_ref[...]
    h1 = jnp.maximum(h1, 0.0)

    # Folded layers 2+3, producing the transposed result directly:
    #   y^T[o, b] = sum_k W23t[o, k] * h1[b, k]   (A @ B^T contraction, like q@k^T)
    yt = lax.dot_general(
        w23t_ref[...], h1.astype(w23t_ref.dtype),
        dimension_numbers=(((1,), (1,)), ((), ())),
        preferred_element_type=jnp.float32,
    ) + b23t_ref[...]

    ot_ref[...] = yt.astype(ot_ref.dtype)


def prepare_params(w1, b1, w2, b2, w3, b3, *, compute_dtype=jnp.bfloat16):
    """One-time parameter prep (hoisted out of the per-call forward).

    wi: [in_i, out_i] f32 (already transposed vs. PyTorch's [out, in])
    bi: [1, out_i]    f32
    Returns (w1c, b1f, w23t, b23t) ready for linear_qnet_forward.
    """
    out_size = w3.shape[1]
    out8 = _round_up(max(out_size, _SUBLANES), _SUBLANES)

    # Fold layers 2+3 in f32 (exact), then cast once.
    w23 = jnp.dot(w2.astype(jnp.float32), w3.astype(jnp.float32))        # (h1, out)
    b23 = jnp.dot(b2.astype(jnp.float32), w3.astype(jnp.float32)) + b3   # (1, out)

    # Transpose for the batch-on-lanes output, pad rows to 8 sublanes.
    w23t = jnp.pad(w23.T, ((0, out8 - out_size), (0, 0)))                # (out8, h1)
    b23t = jnp.pad(b23.T, ((0, out8 - out_size), (0, 0)))                # (out8, 1)

    w1c = w1.astype(compute_dtype)
    b1f = b1.astype(jnp.float32)
    w23t = w23t.astype(compute_dtype)
    b23t = b23t.astype(jnp.float32)
    return w1c, b1f, w23t, b23t


@functools.partial(jax.jit, static_argnames=("out_size", "batch_tile"))
def linear_qnet_forward(x, w1c, b1f, w23t, b23t, *, out_size, batch_tile=8192):
    """Pallas forward pass.

    x: [B, input_size] f32;  params from prepare_params().
    Returns [B, out_size] f32.
    """
    assert batch_tile % _LANES == 0, "batch_tile must be a multiple of 128"
    batch, in_features = x.shape
    h1_features = w1c.shape[1]
    out8 = w23t.shape[0]

    # Batch tiling: tb is a multiple of 128 (it becomes the output lane axis).
    tb = min(batch_tile, _round_up(batch, _LANES))
    padded_b = _round_up(batch, tb)
    if padded_b != batch:
        # Keep the explicit zero-pad: OOB block reads are undefined on TPU.
        x = jnp.pad(x, ((0, padded_b - batch), (0, 0)))

    grid = (padded_b // tb,)

    # Weights/biases: full-array blocks with a constant index_map -> fetched
    # once and kept VMEM-resident across all batch tiles.
    def resident(a):
        return pl.BlockSpec(a.shape, lambda i: (0,) * a.ndim)

    flops = 2 * padded_b * (in_features * h1_features + h1_features * out8)
    bytes_accessed = (
        x.size * 4                                   # f32 x stream
        + w1c.size * 2 + w23t.size * 2               # bf16 weights (resident)
        + b1f.size * 4 + b23t.size * 4
        + padded_b * out8 * 4                        # f32 transposed output
    )

    out_t = pl.pallas_call(
        _mlp_kernel,
        out_shape=jax.ShapeDtypeStruct((out8, padded_b), jnp.float32),
        grid=grid,
        in_specs=[
            pl.BlockSpec((tb, in_features), lambda i: (i, 0)),   # x tile
            resident(w1c), resident(b1f),
            resident(w23t), resident(b23t),
        ],
        out_specs=pl.BlockSpec((out8, tb), lambda i: (0, i)),    # y^T tile
        compiler_params=pltpu.CompilerParams(
            # batch tiles are independent -> shard across TCs on v7x.
            dimension_semantics=("parallel",),
        ),
        cost_estimate=pl.CostEstimate(
            flops=flops, transcendentals=0, bytes_accessed=bytes_accessed),
    )(x, w1c, b1f, w23t, b23t)

    # Strip the padded output rows / batch columns; hand back [B, out_size].
    return out_t[:out_size, :batch].T


def init_linear_params(key, in_features, out_features):
    """PyTorch nn.Linear default init: U(-1/sqrt(fan_in), 1/sqrt(fan_in)).
    Weight returned already transposed to [in, out]."""
    k_w, k_b = jax.random.split(key)
    bound = 1.0 / jnp.sqrt(jnp.float32(in_features))
    w = jax.random.uniform(k_w, (in_features, out_features), jnp.float32,
                           minval=-bound, maxval=bound)
    b = jax.random.uniform(k_b, (1, out_features), jnp.float32,
                           minval=-bound, maxval=bound)
    return w, b


def reference_forward_matched(x, w1, b1, w2, b2, w3, b3):
    """Pure-JAX reference matching the kernel's numerics exactly:
    bf16 MXU inputs, f32 accumulate, layers 2+3 folded in f32."""
    bf16 = jnp.bfloat16
    h1 = jnp.dot(x.astype(bf16), w1.astype(bf16),
                 preferred_element_type=jnp.float32) + b1
    h1 = jnp.maximum(h1, 0.0)
    w23 = jnp.dot(w2, w3)
    b23 = jnp.dot(b2, w3) + b3
    return jnp.dot(h1.astype(bf16), w23.astype(bf16),
                   preferred_element_type=jnp.float32) + b23


def reference_forward_f32(x, w1, b1, w2, b2, w3, b3):
    """Pure-f32 reference with the original (un-folded) PyTorch semantics."""
    h1 = jnp.maximum(jnp.dot(x, w1) + b1, 0.0)
    h2 = jnp.dot(h1, w2) + b2
    return jnp.dot(h2, w3) + b3


if __name__ == "__main__":
    # Small shapes consistent with the module: Q-net on a flat state vector.
    batch = 2
    input_size = 16
    hidden1_size = 32
    hidden2_size = 16   # hidden // 2
    output_size = 4

    key = jax.random.PRNGKey(0)
    kx, k1, k2, k3 = jax.random.split(key, 4)

    x = jax.random.normal(kx, (batch, input_size), jnp.float32)
    w1, b1 = init_linear_params(k1, input_size, hidden1_size)
    w2, b2 = init_linear_params(k2, hidden1_size, hidden2_size)
    w3, b3 = init_linear_params(k3, hidden2_size, output_size)

    # One-time parameter prep (fold 2+3, transpose, pad, bf16 cast).
    params = prepare_params(w1, b1, w2, b2, w3, b3)
    params = jax.tree_util.tree_map(jax.block_until_ready, params)

    out = linear_qnet_forward(x, *params, out_size=output_size)
    out = jax.block_until_ready(out)
    assert out.shape == (batch, output_size)

    # Tight check vs a bf16-matched (folded) reference, loose vs pure f32.
    ref_bf16 = reference_forward_matched(x, w1, b1, w2, b2, w3, b3)
    ref_f32 = reference_forward_f32(x, w1, b1, w2, b2, w3, b3)
    assert jnp.allclose(out, ref_bf16, atol=1e-4, rtol=1e-4), \
        "mismatch vs bf16-matched reference"
    assert jnp.allclose(out, ref_f32, atol=2e-2, rtol=2e-2), \
        "mismatch vs f32 reference"

    # Exercise the batch grid (multiple tiles + non-multiple tail).
    xb = jax.random.normal(kx, (300, input_size), jnp.float32)
    outb = jax.block_until_ready(
        linear_qnet_forward(xb, *params, out_size=output_size, batch_tile=128))
    refb = reference_forward_matched(xb, w1, b1, w2, b2, w3, b3)
    assert outb.shape == (300, output_size)
    assert jnp.allclose(outb, refb, atol=1e-4, rtol=1e-4), \
        "mismatch vs reference on tiled batch"

    print("KERNEL_OK")
</pallas_src>

<mosaic_0001>
module attributes {stable_mosaic.version = 11 : i64} {
  func.func @_mlp_kernel(%arg0: i32, %arg1: memref<128x16xf32, #tpu.memory_space<vmem>>, %arg2: memref<16x32xbf16, #tpu.memory_space<vmem>>, %arg3: memref<1x32xf32, #tpu.memory_space<vmem>>, %arg4: memref<8x32xbf16, #tpu.memory_space<vmem>>, %arg5: memref<8x1xf32, #tpu.memory_space<vmem>>, %arg6: memref<8x128xf32, #tpu.memory_space<vmem>>) attributes {dimension_semantics = [#tpu.dimension_semantics<parallel>], iteration_bounds = array<i64: 1>, scalar_prefetch = 0 : i64, scratch_operands = 0 : i64, tpu.core_type = #tpu.core_type<tc>, window_params = [{transform_indices = @transform_0, window_bounds = array<i64: 128, 16>}, {pipeline_mode = #tpu.pipeline_mode<synchronous>, transform_indices = @transform_1, window_bounds = array<i64: 16, 32>}, {pipeline_mode = #tpu.pipeline_mode<synchronous>, transform_indices = @transform_2, window_bounds = array<i64: 1, 32>}, {pipeline_mode = #tpu.pipeline_mode<synchronous>, transform_indices = @transform_3, window_bounds = array<i64: 8, 32>}, {pipeline_mode = #tpu.pipeline_mode<synchronous>, transform_indices = @transform_4, window_bounds = array<i64: 8, 1>}, {transform_indices = @transform_5, window_bounds = array<i64: 8, 128>}]} {
    %c0 = arith.constant 0 : index
    %c0_0 = arith.constant 0 : index
    %0 = vector.load %arg1[%c0, %c0_0] : memref<128x16xf32, #tpu.memory_space<vmem>>, vector<128x16xf32>
    %1 = arith.truncf %0 : vector<128x16xf32> to vector<128x16xbf16>
    %c0_1 = arith.constant 0 : index
    %c0_2 = arith.constant 0 : index
    %2 = vector.load %arg2[%c0_1, %c0_2] : memref<16x32xbf16, #tpu.memory_space<vmem>>, vector<16x32xbf16>
    %cst = arith.constant dense<0.000000e+00> : vector<128x32xf32>
    %3 = tpu.matmul %1, %2, %cst {dimension_numbers = #tpu.dot_dimension_numbers<[1], [0], [0], [1], [0, 0, 1, 1], [], []>} : vector<128x16xbf16>, vector<16x32xbf16>, vector<128x32xf32> -> vector<128x32xf32>
    %c0_3 = arith.constant 0 : index
    %c0_4 = arith.constant 0 : index
    %4 = vector.load %arg3[%c0_3, %c0_4] : memref<1x32xf32, #tpu.memory_space<vmem>>, vector<1x32xf32>
    %5 = vector.broadcast %4 : vector<1x32xf32> to vector<128x32xf32>
    %6 = arith.addf %3, %5 : vector<128x32xf32>
    %cst_5 = arith.constant 0.000000e+00 : f32
    %7 = vector.broadcast %cst_5 : f32 to vector<128x32xf32>
    %8 = arith.maximumf %6, %7 : vector<128x32xf32>
    %c0_6 = arith.constant 0 : index
    %c0_7 = arith.constant 0 : index
    %9 = vector.load %arg4[%c0_6, %c0_7] : memref<8x32xbf16, #tpu.memory_space<vmem>>, vector<8x32xbf16>
    %10 = arith.truncf %8 : vector<128x32xf32> to vector<128x32xbf16>
    %cst_8 = arith.constant dense<0.000000e+00> : vector<8x128xf32>
    %11 = tpu.matmul %9, %10, %cst_8 {dimension_numbers = #tpu.dot_dimension_numbers<[1], [1], [0], [0], [0, 0, 1, 0], [], []>} : vector<8x32xbf16>, vector<128x32xbf16>, vector<8x128xf32> -> vector<8x128xf32>
    %c0_9 = arith.constant 0 : index
    %c0_10 = arith.constant 0 : index
    %12 = vector.load %arg5[%c0_9, %c0_10] : memref<8x1xf32, #tpu.memory_space<vmem>>, vector<8x1xf32>
    %13 = vector.broadcast %12 : vector<8x1xf32> to vector<8x128xf32>
    %14 = arith.addf %11, %13 : vector<8x128xf32>
    %c0_11 = arith.constant 0 : index
    %c0_12 = arith.constant 0 : index
    %15 = vector.load %arg6[%c0_11, %c0_12] : memref<8x128xf32, #tpu.memory_space<vmem>>, vector<8x128xf32>
    tpu.vector_store %arg6[%c0_11, %c0_12], %14 {strides = array<i32>} : memref<8x128xf32, #tpu.memory_space<vmem>>, vector<8x128xf32>,
    return
  }
  func.func @transform_0(%arg0: i32) -> (i32, i32) {
    %c0_i32 = arith.constant 0 : i32
    %c0_i32_0 = arith.constant 0 : i32
    return %arg0, %c0_i32 : i32, i32
  }
  func.func @transform_1(%arg0: i32) -> (i32, i32) {
    %c0_i32 = arith.constant 0 : i32
    %c0_i32_0 = arith.constant 0 : i32
    %c0_i32_1 = arith.constant 0 : i32
    return %c0_i32, %c0_i32_0 : i32, i32
  }
  func.func @transform_2(%arg0: i32) -> (i32, i32) {
    %c0_i32 = arith.constant 0 : i32
    %c0_i32_0 = arith.constant 0 : i32
    %c0_i32_1 = arith.constant 0 : i32
    return %c0_i32, %c0_i32_0 : i32, i32
  }
  func.func @transform_3(%arg0: i32) -> (i32, i32) {
    %c0_i32 = arith.constant 0 : i32
    %c0_i32_0 = arith.constant 0 : i32
    %c0_i32_1 = arith.constant 0 : i32
    return %c0_i32, %c0_i32_0 : i32, i32
  }
  func.func @transform_4(%arg0: i32) -> (i32, i32) {
    %c0_i32 = arith.constant 0 : i32
    %c0_i32_0 = arith.constant 0 : i32
    %c0_i32_1 = arith.constant 0 : i32
    return %c0_i32, %c0_i32_0 : i32, i32
  }
  func.func @transform_5(%arg0: i32) -> (i32, i32) {
    %c0_i32 = arith.constant 0 : i32
    %c0_i32_0 = arith.constant 0 : i32
    return %c0_i32, %arg0 : i32, i32
  }
}

</mosaic_0001>

<bundles_post_ra>
// kernel: linear_qnet_forward.1
= control target key start
LH: loop header
LB: loop body
LE: loop exit
PB: predicated region body
PF: predicated region fallthrough
CT: control target
= control target key end

     0   :  { %vm57_vm0 = vcmask 130048   ;;  %vm162_vm1 = vcmask 261120   ;;  %s358_s1 = inlined_call_operand.vmem [shape: bf16[16,32], index: 1, kind: input, shape index: {}]   ;;  %s359_s0 = inlined_call_operand.vmem [shape: f32[128,16], index: 0, kind: input, shape index: {}]   ;;  %s360_s2 = inlined_call_operand.vmem [shape: f32[1,32], index: 2, kind: input, shape index: {}]   ;;  %s361_s4 = inlined_call_operand.vmem [shape: f32[8,1], index: 4, kind: input, shape index: {}]   ;;  %s362_s3 = inlined_call_operand.vmem [shape: bf16[8,32], index: 3, kind: input, shape index: {}]   ;;  %s363_s5 = inlined_call_operand.vmem [shape: f32[8,128], index: 5, kind: output, shape index: {}]  }
   0x1   :  { %v221_v0 = vld [vmem:[%s358_s1] sm:$0xff]  ;;  %v30_v2 = vld [vmem:[%s359_s0 + $0x48] sm:$0xff]  ;;  %v31_v7 = vld [vmem:[%s359_s0 + $0x50] sm:$0xff] }
   0x2   :  { %v29_v1 = vld [vmem:[%s359_s0 + $0x40] sm:$0xff]  ;;  %222 = vmatpush.bf16.msra.mxu2 %v221_v0  ;;  %89 = vmatpush.bf16.msra.mxu0 %v221_v0  ;;  %v22_v5 = vld [vmem:[%s359_s0 + $0x8] sm:$0xff]  ;;  %v32_v8 = vld [vmem:[%s359_s0 + $0x58] sm:$0xff] }
   0x3   :  { %v41_v3 = vpack.c.bf16 %v30_v2, %v29_v1  ;;  %v21_v4 = vld [vmem:[%s359_s0] sm:$0xff]  ;;  %v23_v9 = vld [vmem:[%s359_s0 + $0x10] sm:$0xff]  ;;  %v24_v10 = vld [vmem:[%s359_s0 + $0x18] sm:$0xff]  ;;  %v42_v11 = vpack.c.bf16 %v32_v8, %v31_v7 }
   0x4   :  { %v37_v6 = vpack.c.bf16 %v22_v5, %v21_v4  ;;  %v38_v12 = vpack.c.bf16 %v24_v10, %v23_v9  ;;  %v33_v13 = vld [vmem:[%s359_s0 + $0x60] sm:$0xff]  ;;  %v34_v14 = vld [vmem:[%s359_s0 + $0x68] sm:$0xff]  ;;  %v35_v19 = vld [vmem:[%s359_s0 + $0x70] sm:$0xff] }
   0x5   :  { %216 = vmatmul.msk.bf16.vlgmr.msra.gmra.mxu2 %vm57_vm0, %v41_v3  ;;  %v25_v15 = vld [vmem:[%s359_s0 + $0x20] sm:$0xff]  ;;  %v26_v16 = vld [vmem:[%s359_s0 + $0x28] sm:$0xff]  ;;  %v43_v17 = vpack.c.bf16 %v34_v14, %v33_v13  ;;  %v36_v20 = vld [vmem:[%s359_s0 + $0x78] sm:$0xff] }
   0x6   :  { %212 = vmatmul.msk.bf16.vlgmr.msra.gmra.mxu0 %vm57_vm0, %v37_v6  ;;  %v39_v18 = vpack.c.bf16 %v26_v16, %v25_v15  ;;  %v27_v21 = vld [vmem:[%s359_s0 + $0x30] sm:$0xff]  ;;  %v28_v22 = vld [vmem:[%s359_s0 + $0x38] sm:$0xff]  ;;  %v44_v23 = vpack.c.bf16 %v36_v20, %v35_v19  ;;  %v319_v25 = vld [vmem:[%s360_s2] ss:$0 sm:$0xff] }
   0x7   :  { %v40_v24 = vpack.c.bf16 %v28_v22, %v27_v21 }
  0x15   :  { %217 = vmatmul.msk.bf16.gmra.mxu2 %vm57_vm0, %v42_v11 }
  0x16   :  { %213 = vmatmul.msk.bf16.gmra.mxu0 %vm57_vm0, %v38_v12 }
  0x25   :  { %218 = vmatmul.msk.bf16.gmra.mxu2 %vm57_vm0, %v43_v17  ;;  %v156_v17 = vld [vmem:[%s361_s4] sm:$0xff] }
  0x26   :  { %214 = vmatmul.msk.bf16.gmra.mxu0 %vm57_vm0, %v39_v18  ;;  %v226_v18 = vmov 0  }
  0x27   :  { %224 = vset.pattern.permute.xlu0 %v226_v18 }
  0x28   :  { %159 = vperm.xlu0 %224, %v156_v17  }
  0x35   :  { %219 = vmatmul.msk.bf16.gmra.mxu2 %vm57_vm0, %v44_v23 }
  0x36   :  { %215 = vmatmul.msk.bf16.gmra.mxu0 %vm57_vm0, %v40_v24 }
  0x83   :  { %v91_v26 = vpop.f32.mrf.mxu0 }
  0x84   :  { %v92_v27 = vadd.f32 %v319_v25, %v91_v26 }
  0x86   :  { %v131_v31 = vmax.f32 %v92_v27, 0.0 }
  0x88   :  { %v111_v28 = vpop.f32.mrf.mxu2 }
  0x89   :  { %v112_v29 = vadd.f32 %v319_v25, %v111_v28 }
  0x8b   :  { %v93_v30 = vpop.f32.mrf.mxu0  ;;  %v139_v37 = vmax.f32 %v112_v29, 0.0  ;;  %v147_v29 = vld [vmem:[%s362_s3] sm:$0xf] }
  0x8c   :  { %v94_v32 = vadd.f32 %v319_v25, %v93_v30 }
  0x8e   :  { %v132_v33 = vmax.f32 %v94_v32, 0.0 }
  0x90   :  { %v324_v34 = vpack.c.bf16 %v132_v33, %v131_v31  ;;  %v113_v35 = vpop.f32.mrf.mxu2 }
  0x91   :  { %v114_v36 = vadd.f32 %v319_v25, %v113_v35 }
  0x92   :  { %v167_v28 = vsel %vm162_vm1, %v324_v34, 0 }
  0x93   :  { %v140_v38 = vmax.f32 %v114_v36, 0.0  ;;  %v96_v42 = vpop.f32.mrf.mxu0 }
  0x94   :  { %v97_v19 = vadd.f32 %v319_v25, %v96_v42 }
  0x95   :  { %v152_v39 = vpack.c.bf16 %v140_v38, %v139_v37 }
  0x96   :  { %v133_v22 = vmax.f32 %v97_v19, 0.0 }
  0x97   :  { %v179_v10 = vsel %vm162_vm1, %v152_v39, 0 }
  0x98   :  { %v116_v40 = vpop.f32.mrf.mxu2 }
  0x99   :  { %v117_v62 = vadd.f32 %v319_v25, %v116_v40 }
  0x9b   :  { %v98_v45 = vpop.f32.mrf.mxu0  ;;  %v141_v2 = vmax.f32 %v117_v62, 0.0 }
  0x9c   :  { %v99_v20 = vadd.f32 %v319_v25, %v98_v45 }
  0x9e   :  { %v134_v23 = vmax.f32 %v99_v20, 0.0 }
  0xa0   :  { %v118_v41 = vpop.f32.mrf.mxu2  ;;  %v149_v26 = vpack.c.bf16 %v134_v23, %v133_v22 }
  0xa1   :  { %v119_v60 = vadd.f32 %v319_v25, %v118_v41 }
  0xa2   :  { %v170_v27 = vsel %vm162_vm1, %v149_v26, 0 }
  0xa3   :  { %v101_v47 = vpop.f32.mrf.mxu0  ;;  %v142_v0 = vmax.f32 %v119_v60, 0.0 }
  0xa4   :  { %v102_v11 = vadd.f32 %v319_v25, %v101_v47 }
  0xa5   :  { %v153_v3 = vpack.c.bf16 %v142_v0, %v141_v2 }
  0xa6   :  { %v135_v14 = vmax.f32 %v102_v11, 0.0 }
  0xa7   :  { %v182_v4 = vsel %vm162_vm1, %v153_v3, 0 }
  0xa8   :  { %v121_v43 = vpop.f32.mrf.mxu2 }
  0xa9   :  { %v122_v55 = vadd.f32 %v319_v25, %v121_v43 }
  0xab   :  { %v103_v54 = vpop.f32.mrf.mxu0  ;;  %v143_v59 = vmax.f32 %v122_v55, 0.0 }
  0xac   :  { %v104_v12 = vadd.f32 %v319_v25, %v103_v54 }
  0xae   :  { %v136_v15 = vmax.f32 %v104_v12, 0.0 }
  0xb0   :  { %v123_v44 = vpop.f32.mrf.mxu2  ;;  %v150_v21 = vpack.c.bf16 %v136_v15, %v135_v14 }
  0xb1   :  { %v124_v51 = vadd.f32 %v319_v25, %v123_v44 }
  0xb2   :  { %v173_v24 = vsel %vm162_vm1, %v150_v21, 0 }
  0xb3   :  { %v144_v57 = vmax.f32 %v124_v51, 0.0  ;;  %v106_v63 = vpop.f32.mrf.mxu0 }
  0xb4   :  { %v107_v6 = vadd.f32 %v319_v25, %v106_v63 }
  0xb5   :  { %v154_v61 = vpack.c.bf16 %v144_v57, %v143_v59 }
  0xb6   :  { %v137_v8 = vmax.f32 %v107_v6, 0.0 }
  0xb7   :  { %v185_v1 = vsel %vm162_vm1, %v154_v61, 0 }
  0xb8   :  { %v126_v46 = vpop.f32.mrf.mxu2 }
  0xb9   :  { %v127_v48 = vadd.f32 %v319_v25, %v126_v46 }
  0xbb   :  { %v145_v52 = vmax.f32 %v127_v48, 0.0  ;;  %v108_v5 = vpop.f32.mrf.mxu0 }
  0xbc   :  { %v109_v7 = vadd.f32 %v319_v25, %v108_v5 }
  0xbe   :  { %v138_v9 = vmax.f32 %v109_v7, 0.0 }
  0xc0   :  { %v128_v49 = vpop.f32.mrf.mxu2  ;;  %v151_v13 = vpack.c.bf16 %v138_v9, %v137_v8 }
  0xc1   :  { %v129_v50 = vadd.f32 %v319_v25, %v128_v49  ;;  %v160_v25 = vpop.permute.xlu0 %159 }
  0xc2   :  { %v176_v16 = vsel %vm162_vm1, %v151_v13, 0 }
  0xc3   :  { %v146_v53 = vmax.f32 %v129_v50, 0.0 }
  0xc5   :  { %v155_v56 = vpack.c.bf16 %v146_v53, %v145_v52 }
  0xc7   :  { %v188_v58 = vsel %vm162_vm1, %v155_v56, 0 }
  0xc8   :  { %190 = vmatpush.bf16.xpose.msra.mxu1 %v188_v58 }
  0xd0   :  { %191 = vmatpush.bf16.xpose.msra.mxu1 %v185_v1 }
  0xd8   :  { %192 = vmatpush.bf16.xpose.msra.mxu1 %v182_v4 }
  0xe0   :  { %193 = vmatpush.bf16.xpose.msra.mxu1 %v179_v10 }
  0xe8   :  { %194 = vmatpush.bf16.xpose.msra.mxu1 %v176_v16 }
  0xf0   :  { %195 = vmatpush.bf16.xpose.msra.mxu1 %v173_v24 }
  0xf8   :  { %196 = vmatpush.bf16.xpose.msra.mxu1 %v170_v27 }
 0x100   :  { %197 = vmatpush.bf16.xpose.msra.mxu1 %v167_v28 }
 0x107   :  { %220 = vmatmul.msk.bf16.vlgmr.msra.gmra.mxu1 %vm162_vm1, %v147_v29 }
 0x184   :  { %v199_v30 = vpop.f32.mrf.mxu1 }
 0x185   :  { %v200_v31 = vadd.f32 %v199_v30, %v160_v25 }
 0x187   :  { %203 = vst [vmem:[%s363_s5] sm:$0xff] %v200_v31 }
 0x18c   :  { %v201_v32 = vpop.f32.mrf.mxu1 }

</bundles_post_ra>
